<compile_context>
chip_gen: v6e
topology: v6e:2x2x1
jax: 0.10.0
libtpu: 0.0.40
codegen_flags: <defaults>
</compile_context>

<pallas_src>
import functools

import jax
import jax.numpy as jnp
from jax.experimental import pallas as pl
from jax.experimental.pallas import tpu as pltpu


def _round_up(x, m):
    return (x + m - 1) // m * m


def cnn_kernel(tok3_ref, wbig_ref, bc_ref, wo_ref, bo_ref, out_ref, *, L, Vp):
    # tok3_ref: (Bt*L, 3) int32  token id feeding tap k at each output position
    #                            (positions l-1, l, l+1; -1 sentinel = zero pad)
    # wbig_ref: (3*Vp, F) bf16   emb @ conv_w[:,:,k].T stacked per tap (rows >= V are 0)
    # bc_ref:   (1, F)    f32    conv bias
    # wo_ref:   (F, O)    bf16   linear weight (transposed vs PyTorch)
    # bo_ref:   (1, O)    f32    linear bias
    # out_ref:  (Bt, O)   f32
    R = tok3_ref.shape[0]          # Bt * L (static)
    Bt = R // L
    F_ = wbig_ref.shape[1]

    t = tok3_ref[...]                                            # (R, 3) int32
    col = jax.lax.broadcasted_iota(jnp.int32, (R, Vp), 1)        # lane index 0..Vp-1

    # Per-tap one-hot rows; sentinel -1 never matches -> all-zero row (= conv zero pad
    # and discarded batch-padding rows).  Vp is a multiple of 128, so the concat is
    # vreg-aligned (no lane relayout).
    oh = [(col == t[:, k:k + 1]).astype(jnp.bfloat16) for k in range(3)]
    one_hot3 = jnp.concatenate(oh, axis=1)                       # (R, 3*Vp) bf16

    # Fused gather + 3-tap conv as a single MXU matmul (f32 accumulation).
    conv = (jnp.dot(one_hot3, wbig_ref[...], preferred_element_type=jnp.float32)
            + bc_ref[...])                                       # (R, F) f32

    h = jnp.maximum(conv, 0.0).reshape(Bt, L, F_)                # ReLU
    pooled = jnp.max(h, axis=1)                                  # AdaptiveMaxPool1d(1) -> (Bt, F)

    out_ref[...] = (jnp.dot(pooled.astype(jnp.bfloat16), wo_ref[...],
                            preferred_element_type=jnp.float32)
                    + bo_ref[...])                               # (Bt, O) f32


def cnn_forward(tokens, emb_table, conv_w, conv_b, lin_w, lin_b, *, block_b=512):
    """tokens: (B, L) int32; returns (B, output_dim) float32.

    Per grid step the input DMA is only Bt*L*3*4 B of token ids plus ~25 KB of
    resident weights; in-kernel temporaries (one-hot + conv f32) are a few MB at
    the default Bt=512, comfortably inside the 32 MiB scoped-VMEM limit set below
    (v5e default is only 16 MiB, v7x physical VMEM is 64 MiB).
    """
    B, L = tokens.shape
    V, E = emb_table.shape
    F_, E2, K = conv_w.shape                 # (filters, E, 3)
    O = lin_w.shape[0]                       # (output_dim, filters)
    assert K == 3 and E2 == E

    # --- batch tiling: Bt multiple of 8; prefer >= 2 grid steps (v7x has 2 TCs
    #     sharded over the "parallel" axis); rebalance Bt to minimize pad rows ---
    B8 = _round_up(B, 8)
    Bt = max(8, min(_round_up(block_b, 8), B8))
    n_blocks = pl.cdiv(B8, Bt)
    if n_blocks == 1 and B8 >= 16:
        n_blocks = 2
    Bt = _round_up(pl.cdiv(B8, n_blocks), 8)
    n_blocks = pl.cdiv(B8, Bt)
    B_pad = n_blocks * Bt

    Vp = _round_up(V, 128)                   # lane-aligned one-hot blocks

    # --- tokens: pad batch & sequence with -1 sentinel (=> zero one-hot rows),
    #     and lay out the three taps' token ids contiguously per output position ---
    tok = jnp.pad(tokens.astype(jnp.int32), ((0, B_pad - B), (0, 0)), constant_values=-1)
    tp = jnp.pad(tok, ((0, 0), (1, 1)), constant_values=-1)                    # (B_pad, L+2)
    tok3 = jnp.stack([tp[:, 0:L], tp[:, 1:L + 1], tp[:, 2:L + 2]], axis=-1)    # (B_pad, L, 3)
    tok3 = tok3.reshape(B_pad * L, 3)

    # --- fold the embedding table into the conv tap weights (once, f32, tiny) ---
    emb_f32 = emb_table.astype(jnp.float32)
    cw_f32 = conv_w.astype(jnp.float32)
    wbig = jnp.zeros((3 * Vp, F_), jnp.float32)
    for k in range(3):
        wbig = wbig.at[k * Vp:k * Vp + V].set(emb_f32 @ cw_f32[:, :, k].T)     # (V, F)
    wbig = wbig.astype(jnp.bfloat16)                                           # (3*Vp, F)

    bc = conv_b.reshape(1, F_).astype(jnp.float32)
    wo = lin_w.T.astype(jnp.bfloat16)                                          # (F, O)
    bo = lin_b.reshape(1, O).astype(jnp.float32)

    kernel = functools.partial(cnn_kernel, L=L, Vp=Vp)

    grid_spec = pltpu.PrefetchScalarGridSpec(
        num_scalar_prefetch=0,
        grid=(n_blocks,),
        in_specs=[
            pl.BlockSpec((Bt * L, 3), lambda b: (b, 0)),     # token ids (batch-tiled)
            pl.BlockSpec((3 * Vp, F_), lambda b: (0, 0)),    # folded emb/conv weight (resident)
            pl.BlockSpec((1, F_), lambda b: (0, 0)),
            pl.BlockSpec((F_, O), lambda b: (0, 0)),
            pl.BlockSpec((1, O), lambda b: (0, 0)),
        ],
        out_specs=pl.BlockSpec((Bt, O), lambda b: (b, 0)),
    )

    cost = pl.CostEstimate(
        flops=2 * B_pad * L * (3 * Vp) * F_ + 2 * B_pad * F_ * O,
        transcendentals=0,
        bytes_accessed=(B_pad * L * 3 * 4            # token ids
                        + 3 * Vp * F_ * 2 + F_ * 4   # wbig + conv bias
                        + F_ * O * 2 + O * 4         # linear weight + bias
                        + B_pad * O * 4),            # output
    )

    out = pl.pallas_call(
        kernel,
        out_shape=jax.ShapeDtypeStruct((B_pad, O), jnp.float32),
        grid_spec=grid_spec,
        compiler_params=pltpu.CompilerParams(
            dimension_semantics=("parallel",),
            vmem_limit_bytes=32 * 1024 * 1024,
        ),
        cost_estimate=cost,
    )(tok3, wbig, bc, wo, bo)

    return out[:B]


def cnn_forward_ref(tokens, emb_table, conv_w, conv_b, lin_w, lin_b):
    """Pure-JAX f32 reference mirroring the PyTorch forward (channels-last conv)."""
    x = jnp.take(emb_table, tokens, axis=0)                              # (B, L, E)
    xp = jnp.pad(x, ((0, 0), (1, 1), (0, 0)))
    L = x.shape[1]
    conv = (xp[:, 0:L, :] @ conv_w[:, :, 0].T
            + xp[:, 1:L + 1, :] @ conv_w[:, :, 1].T
            + xp[:, 2:L + 2, :] @ conv_w[:, :, 2].T
            + conv_b[None, None, :])                                     # (B, L, F)
    h = jnp.maximum(conv, 0.0)
    pooled = jnp.max(h, axis=1)                                          # (B, F)
    return pooled @ lin_w.T + lin_b[None, :]


if __name__ == "__main__":
    # Small, module-consistent shapes
    vocab_size = 50
    embedding_dim = 32
    filters = 32
    output_dim = 4
    B, L = 2, 8

    key = jax.random.PRNGKey(0)
    k_tok, k_emb, k_cw, k_cb, k_lw, k_lb = jax.random.split(key, 6)

    tokens = jax.random.randint(k_tok, (B, L), 0, vocab_size, dtype=jnp.int32)

    # Deterministic parameter init (synthetic; shapes match nn.Module __init__)
    emb_table = jax.random.normal(k_emb, (vocab_size, embedding_dim), jnp.float32)
    conv_w = 0.1 * jax.random.normal(k_cw, (filters, embedding_dim, 3), jnp.float32)
    conv_b = 0.1 * jax.random.normal(k_cb, (filters,), jnp.float32)
    lin_w = 0.1 * jax.random.normal(k_lw, (output_dim, filters), jnp.float32)
    lin_b = 0.1 * jax.random.normal(k_lb, (output_dim,), jnp.float32)

    out = cnn_forward(tokens, emb_table, conv_w, conv_b, lin_w, lin_b)
    out = jax.block_until_ready(out)

    ref = cnn_forward_ref(tokens, emb_table, conv_w, conv_b, lin_w, lin_b)
    assert out.shape == (B, output_dim)
    # bf16 weights on the MXU (f32 accumulation) -> loosened tolerance
    assert jnp.allclose(out, ref, atol=2e-2, rtol=2e-2), (out, ref)

    print("KERNEL_OK")
</pallas_src>

<mosaic_0001>
module attributes {stable_mosaic.version = 11 : i64} {
  func.func @cnn_kernel(%arg0: i32, %arg1: memref<64x3xi32, #tpu.memory_space<vmem>>, %arg2: memref<384x32xbf16, #tpu.memory_space<vmem>>, %arg3: memref<1x32xf32, #tpu.memory_space<vmem>>, %arg4: memref<32x4xbf16, #tpu.memory_space<vmem>>, %arg5: memref<1x4xf32, #tpu.memory_space<vmem>>, %arg6: memref<8x4xf32, #tpu.memory_space<vmem>>) attributes {dimension_semantics = [#tpu.dimension_semantics<parallel>], iteration_bounds = array<i64: 1>, scalar_prefetch = 0 : i64, scratch_operands = 0 : i64, tpu.core_type = #tpu.core_type<tc>, window_params = [{transform_indices = @transform_0, window_bounds = array<i64: 64, 3>}, {pipeline_mode = #tpu.pipeline_mode<synchronous>, transform_indices = @transform_1, window_bounds = array<i64: 384, 32>}, {pipeline_mode = #tpu.pipeline_mode<synchronous>, transform_indices = @transform_2, window_bounds = array<i64: 1, 32>}, {pipeline_mode = #tpu.pipeline_mode<synchronous>, transform_indices = @transform_3, window_bounds = array<i64: 32, 4>}, {pipeline_mode = #tpu.pipeline_mode<synchronous>, transform_indices = @transform_4, window_bounds = array<i64: 1, 4>}, {transform_indices = @transform_5, window_bounds = array<i64: 8, 4>}]} {
    %c0 = arith.constant 0 : index
    %c0_0 = arith.constant 0 : index
    %0 = vector.load %arg1[%c0, %c0_0] : memref<64x3xi32, #tpu.memory_space<vmem>>, vector<64x3xi32>
    %1 = tpu.iota {dimensions = array<i32: 1>} : vector<64x128xi32>
    %2 = vector.extract_strided_slice %0 {offsets = [0, 0], sizes = [64, 1], strides = [1, 1]} : vector<64x3xi32> to vector<64x1xi32>
    %3 = vector.broadcast %2 : vector<64x1xi32> to vector<64x128xi32>
    %4 = arith.cmpi eq, %1, %3 : vector<64x128xi32>
    %5 = arith.extui %4 : vector<64x128xi1> to vector<64x128xi32>
    %6 = arith.sitofp %5 : vector<64x128xi32> to vector<64x128xf32>
    %7 = arith.truncf %6 : vector<64x128xf32> to vector<64x128xbf16>
    %8 = vector.extract_strided_slice %0 {offsets = [0, 1], sizes = [64, 1], strides = [1, 1]} : vector<64x3xi32> to vector<64x1xi32>
    %9 = vector.broadcast %8 : vector<64x1xi32> to vector<64x128xi32>
    %10 = arith.cmpi eq, %1, %9 : vector<64x128xi32>
    %11 = arith.extui %10 : vector<64x128xi1> to vector<64x128xi32>
    %12 = arith.sitofp %11 : vector<64x128xi32> to vector<64x128xf32>
    %13 = arith.truncf %12 : vector<64x128xf32> to vector<64x128xbf16>
    %14 = vector.extract_strided_slice %0 {offsets = [0, 2], sizes = [64, 1], strides = [1, 1]} : vector<64x3xi32> to vector<64x1xi32>
    %15 = vector.broadcast %14 : vector<64x1xi32> to vector<64x128xi32>
    %16 = arith.cmpi eq, %1, %15 : vector<64x128xi32>
    %17 = arith.extui %16 : vector<64x128xi1> to vector<64x128xi32>
    %18 = arith.sitofp %17 : vector<64x128xi32> to vector<64x128xf32>
    %19 = arith.truncf %18 : vector<64x128xf32> to vector<64x128xbf16>
    %20 = tpu.concatenate %7, %13, %19 in 1 : vector<64x128xbf16>, vector<64x128xbf16>, vector<64x128xbf16> -> vector<64x384xbf16>
    %c0_1 = arith.constant 0 : index
    %c0_2 = arith.constant 0 : index
    %21 = vector.load %arg2[%c0_1, %c0_2] : memref<384x32xbf16, #tpu.memory_space<vmem>>, vector<384x32xbf16>
    %cst = arith.constant dense<0.000000e+00> : vector<64x32xf32>
    %22 = tpu.matmul %20, %21, %cst {dimension_numbers = #tpu.dot_dimension_numbers<[1], [0], [0], [1], [0, 0, 1, 1], [], []>} : vector<64x384xbf16>, vector<384x32xbf16>, vector<64x32xf32> -> vector<64x32xf32>
    %c0_3 = arith.constant 0 : index
    %c0_4 = arith.constant 0 : index
    %23 = vector.load %arg3[%c0_3, %c0_4] : memref<1x32xf32, #tpu.memory_space<vmem>>, vector<1x32xf32>
    %24 = vector.broadcast %23 : vector<1x32xf32> to vector<64x32xf32>
    %25 = arith.addf %22, %24 : vector<64x32xf32>
    %cst_5 = arith.constant 0.000000e+00 : f32
    %26 = vector.broadcast %cst_5 : f32 to vector<64x32xf32>
    %27 = arith.maximumf %25, %26 : vector<64x32xf32>
    %28 = vector.shape_cast %27 : vector<64x32xf32> to vector<8x8x32xf32>
    %cst_6 = arith.constant dense<0xFF800000> : vector<8x32xf32>
    %29 = vector.multi_reduction <maximumf>, %28, %cst_6 [1] : vector<8x8x32xf32> to vector<8x32xf32>
    %30 = arith.truncf %29 : vector<8x32xf32> to vector<8x32xbf16>
    %c0_7 = arith.constant 0 : index
    %c0_8 = arith.constant 0 : index
    %31 = vector.load %arg4[%c0_7, %c0_8] : memref<32x4xbf16, #tpu.memory_space<vmem>>, vector<32x4xbf16>
    %cst_9 = arith.constant dense<0.000000e+00> : vector<8x4xf32>
    %32 = tpu.matmul %30, %31, %cst_9 {dimension_numbers = #tpu.dot_dimension_numbers<[1], [0], [0], [1], [0, 0, 1, 1], [], []>} : vector<8x32xbf16>, vector<32x4xbf16>, vector<8x4xf32> -> vector<8x4xf32>
    %c0_10 = arith.constant 0 : index
    %c0_11 = arith.constant 0 : index
    %33 = vector.load %arg5[%c0_10, %c0_11] : memref<1x4xf32, #tpu.memory_space<vmem>>, vector<1x4xf32>
    %34 = vector.broadcast %33 : vector<1x4xf32> to vector<8x4xf32>
    %35 = arith.addf %32, %34 : vector<8x4xf32>
    %c0_12 = arith.constant 0 : index
    %c0_13 = arith.constant 0 : index
    %36 = vector.load %arg6[%c0_12, %c0_13] : memref<8x4xf32, #tpu.memory_space<vmem>>, vector<8x4xf32>
    tpu.vector_store %arg6[%c0_12, %c0_13], %35 {strides = array<i32>} : memref<8x4xf32, #tpu.memory_space<vmem>>, vector<8x4xf32>,
    return
  }
  func.func @transform_0(%arg0: i32) -> (i32, i32) {
    %c0_i32 = arith.constant 0 : i32
    %c0_i32_0 = arith.constant 0 : i32
    return %arg0, %c0_i32 : i32, i32
  }
  func.func @transform_1(%arg0: i32) -> (i32, i32) {
    %c0_i32 = arith.constant 0 : i32
    %c0_i32_0 = arith.constant 0 : i32
    %c0_i32_1 = arith.constant 0 : i32
    return %c0_i32, %c0_i32_0 : i32, i32
  }
  func.func @transform_2(%arg0: i32) -> (i32, i32) {
    %c0_i32 = arith.constant 0 : i32
    %c0_i32_0 = arith.constant 0 : i32
    %c0_i32_1 = arith.constant 0 : i32
    return %c0_i32, %c0_i32_0 : i32, i32
  }
  func.func @transform_3(%arg0: i32) -> (i32, i32) {
    %c0_i32 = arith.constant 0 : i32
    %c0_i32_0 = arith.constant 0 : i32
    %c0_i32_1 = arith.constant 0 : i32
    return %c0_i32, %c0_i32_0 : i32, i32
  }
  func.func @transform_4(%arg0: i32) -> (i32, i32) {
    %c0_i32 = arith.constant 0 : i32
    %c0_i32_0 = arith.constant 0 : i32
    %c0_i32_1 = arith.constant 0 : i32
    return %c0_i32, %c0_i32_0 : i32, i32
  }
  func.func @transform_5(%arg0: i32) -> (i32, i32) {
    %c0_i32 = arith.constant 0 : i32
    %c0_i32_0 = arith.constant 0 : i32
    return %arg0, %c0_i32 : i32, i32
  }
}

</mosaic_0001>

<bundles_post_ra>
// kernel: tpu_custom_call.1
= control target key start
LH: loop header
LB: loop body
LE: loop exit
PB: predicated region body
PF: predicated region fallthrough
CT: control target
= control target key end

     0   :  { %v900_v0 = vmov 0   ;;  %v901_v6 = vmov 1   ;;  %v902_v25 = vmov 2   ;;  %v29_v37 = vlaneseq  ;;  %s1106_s0 = inlined_call_operand.vmem [shape: s32[64,3], index: 0, kind: input, shape index: {}]   ;;  %s1107_s1 = inlined_call_operand.vmem [shape: bf16[384,32], index: 1, kind: input, shape index: {}]   ;;  %s1108_s3 = inlined_call_operand.vmem [shape: bf16[32,4], index: 3, kind: input, shape index: {}]   ;;  %s1109_s2 = inlined_call_operand.vmem [shape: f32[1,32], index: 2, kind: input, shape index: {}]   ;;  %s1110_s4 = inlined_call_operand.vmem [shape: f32[1,4], index: 4, kind: input, shape index: {}]   ;;  %s1111_s5 = inlined_call_operand.vmem [shape: f32[8,4], index: 5, kind: output, shape index: {}]  }
   0x1   :  { %864 = vset.pattern.permute.xlu0 %v900_v0  ;;  %862 = vset.pattern.permute.xlu1 %v900_v0  ;;  %v941_v1 = vld [vmem:[%s1106_s0 + $0x10] sm:$0xff]  ;;  %v21_v2 = vld [vmem:[%s1106_s0] sm:$0xff]  ;;  %v950_v3 = vld [vmem:[%s1106_s0 + $0x8] sm:$0xff]  ;;  %v903_v43 = vmov 1.0|1.0   ;;  %v904_v63 = vmov 0.0  }
   0x2   :  { %38 = vperm.xlu0 %864, %v941_v1   ;;  %32 = vperm.xlu1 %862, %v21_v2   ;;  %v874_v4 = vld [vmem:[%s1107_s1 + $0x78] sm:$0xff]   ;;  %v876_v7 = vld [vmem:[%s1107_s1 + $0x70] sm:$0xff]   ;;  %v878_v10 = vld [vmem:[%s1107_s1 + $0x68] sm:$0xff]   ;;  %v1056_v40 = vand.u32 127, %v29_v37 }
   0x3   :  { %v875_v5 = vld [vmem:[%s1107_s1 + $0x38] sm:$0xff]   ;;  %769 = vmatprep.subr.bf16.mxu0 %v874_v4  ;;  %v877_v9 = vld [vmem:[%s1107_s1 + $0x30] sm:$0xff]   ;;  %v879_v11 = vld [vmem:[%s1107_s1 + $0x28] sm:$0xff]  }
   0x4   :  { %v24_v8 = vld [vmem:[%s1106_s0 + $0x18] sm:$0xff]  ;;  %770 = vmatpush3.bf16.msra.mxu0 %v875_v5  ;;  %v880_v12 = vld [vmem:[%s1107_s1 + $0x60] sm:$0xff]   ;;  %v985_v13 = vld [vmem:[%s1106_s0 + $0x28] sm:$0xff] }
   0x5   :  { %771 = vmatprep.subr.bf16.mxu0 %v876_v7  ;;  %v25_v14 = vld [vmem:[%s1106_s0 + $0x20] sm:$0xff]  ;;  %v882_v16 = vld [vmem:[%s1107_s1 + $0x58] sm:$0xff]   ;;  %v884_v20 = vld [vmem:[%s1107_s1 + $0x50] sm:$0xff]  }
   0x6   :  { %865 = vset.pattern.permute.xlu0 %v901_v6  ;;  %35 = vperm.xlu1 %862, %v950_v3   ;;  %v881_v15 = vld [vmem:[%s1107_s1 + $0x20] sm:$0xff]   ;;  %v28_v17 = vld [vmem:[%s1106_s0 + $0x38] sm:$0xff]  ;;  %v891_v21 = vld [vmem:[%s1107_s1 + $0xb0] sm:$0xff]  }
   0x7   :  { %84 = vperm.xlu0 %865, %v21_v2   ;;  %v888_v18 = vld [vmem:[%s1107_s1 + $0xb8] sm:$0xff]   ;;  %v885_v22 = vld [vmem:[%s1107_s1 + $0x10] sm:$0xff]   ;;  %v886_v23 = vld [vmem:[%s1107_s1 + $0x48] sm:$0xff]  }
   0x8   :  { %772 = vmatpush3.bf16.msra.mxu0 %v877_v9  ;;  %v883_v19 = vld [vmem:[%s1107_s1 + $0x18] sm:$0xff]   ;;  %824 = vmatprep.subr.bf16.mxu1 %v888_v18  ;;  %v892_v24 = vld [vmem:[%s1107_s1 + $0xa8] sm:$0xff]   ;;  %v889_v27 = vld [vmem:[%s1107_s1 + $0x40] sm:$0xff]  }
   0x9   :  { %773 = vmatprep.subr.bf16.mxu0 %v878_v10  ;;  %825 = vmatpush3.bf16.msra.mxu1 %v888_v18  ;;  %v887_v26 = vld [vmem:[%s1107_s1 + $0x8] sm:$0xff]   ;;  %v893_v28 = vld [vmem:[%s1107_s1 + $0xa0] sm:$0xff]   ;;  %v894_v30 = vld [vmem:[%s1107_s1 + $0x98] sm:$0xff]  }
   0xa   :  { %863 = vset.pattern.permute.xlu1 %v901_v6  ;;  %826 = vmatprep.subr.bf16.mxu1 %v891_v21  ;;  %v890_v29 = vld [vmem:[%s1107_s1] sm:$0xff]   ;;  %v895_v31 = vld [vmem:[%s1107_s1 + $0x90] sm:$0xff]   ;;  %v896_v32 = vld [vmem:[%s1107_s1 + $0x88] sm:$0xff]  }
   0xb   :  { %87 = vperm.xlu0 %865, %v950_v3   ;;  %93 = vperm.xlu1 %863, %v24_v8   ;;  %v27_v33 = vld [vmem:[%s1106_s0 + $0x30] sm:$0xff]  ;;  %v897_v34 = vld [vmem:[%s1107_s1 + $0x80] sm:$0xff]   ;;  %v898_v62 = vld [vmem:[%s1108_s3 + $0x8] sm:$0xff]  }
   0xc   :  { %774 = vmatpush3.bf16.msra.mxu0 %v879_v11  ;;  %v716_v10 = vld [vmem:[%s1109_s2] ss:$0 sm:$0xff] }
   0xd   :  { %775 = vmatprep.subr.bf16.mxu0 %v880_v12  ;;  %827 = vmatpush3.bf16.msra.mxu1 %v891_v21 }
   0xe   :  { %828 = vmatprep.subr.bf16.mxu1 %v892_v24 }
   0xf   :  { %90 = vperm.xlu0 %865, %v941_v1   ;;  %866 = vset.pattern.permute.xlu1 %v900_v0 }
  0x10   :  { %41 = vperm.xlu1 %866, %v24_v8   ;;  %776 = vmatpush3.bf16.msra.mxu0 %v881_v15 }
  0x11   :  { %777 = vmatprep.subr.bf16.mxu0 %v882_v16  ;;  %829 = vmatpush3.bf16.msra.mxu1 %v892_v24 }
  0x12   :  { %830 = vmatprep.subr.bf16.mxu1 %v893_v28 }
  0x13   :  { %99 = vperm.xlu0 %865, %v985_v13  }
  0x14   :  { %867 = vset.pattern.permute.xlu1 %v901_v6  ;;  %778 = vmatpush3.bf16.msra.mxu0 %v883_v19 }
  0x15   :  { %96 = vperm.xlu1 %867, %v25_v14   ;;  %779 = vmatprep.subr.bf16.mxu0 %v884_v20 }
  0x16   :  { %831 = vmatpush3.bf16.msra.mxu1 %v893_v28 }
  0x17   :  { %105 = vperm.xlu0 %865, %v28_v17   ;;  %832 = vmatprep.subr.bf16.mxu1 %v894_v30 }
  0x18   :  { %780 = vmatpush3.bf16.msra.mxu0 %v885_v22 }
  0x19   :  { %868 = vset.pattern.permute.xlu1 %v900_v0  ;;  %781 = vmatprep.subr.bf16.mxu0 %v886_v23 }
  0x1a   :  { %44 = vperm.xlu1 %868, %v25_v14   ;;  %833 = vmatpush3.bf16.msra.mxu1 %v894_v30 }
  0x1b   :  { %871 = vset.pattern.permute.xlu0 %v902_v25  ;;  %834 = vmatprep.subr.bf16.mxu1 %v895_v31 }
  0x1c   :  { %136 = vperm.xlu0 %871, %v21_v2   ;;  %782 = vmatpush3.bf16.msra.mxu0 %v887_v26 }
  0x1d   :  { %783 = vmatprep.subr.bf16.mxu0 %v889_v27 }
  0x1e   :  { %47 = vperm.xlu1 %868, %v985_v13   ;;  %835 = vmatpush3.bf16.msra.mxu1 %v895_v31 }
  0x1f   :  { %836 = vmatprep.subr.bf16.mxu1 %v896_v32 }
  0x20   :  { %145 = vperm.xlu0 %871, %v24_v8   ;;  %784 = vmatpush3.bf16.msra.mxu0 %v890_v29 }
  0x22   :  { %869 = vset.pattern.permute.xlu1 %v902_v25  ;;  %837 = vmatpush3.bf16.msra.mxu1 %v896_v32 }
  0x23   :  { %139 = vperm.xlu1 %869, %v950_v3   ;;  %838 = vmatprep.subr.bf16.mxu1 %v897_v34 }
  0x24   :  { %148 = vperm.xlu0 %871, %v25_v14  }
  0x26   :  { %839 = vmatpush3.bf16.msra.mxu1 %v897_v34 }
  0x27   :  { %142 = vperm.xlu1 %869, %v941_v1   ;;  %848 = vmatprep.subr.bf16.mxu1 %v904_v63 }
  0x28   :  { %157 = vperm.xlu0 %871, %v28_v17  }
  0x2b   :  { %870 = vset.pattern.permute.xlu1 %v901_v6 }
  0x2c   :  { %102 = vperm.xlu1 %870, %v27_v33  }
  0x30   :  { %872 = vset.pattern.permute.xlu1 %v900_v0  ;;  %v899_v0 = vld [vmem:[%s1108_s3] sm:$0xff]  }
  0x31   :  { %50 = vperm.xlu1 %872, %v27_v33  }
  0x35   :  { %53 = vperm.xlu1 %872, %v28_v17  }
  0x39   :  { %873 = vset.pattern.permute.xlu1 %v902_v25 }
  0x3a   :  { %151 = vperm.xlu1 %873, %v985_v13  }
  0x3e   :  { %154 = vperm.xlu1 %873, %v27_v33  }
  0x7d   :  { %v33_v35 = vpop.permute.xlu1 %32  ;;  %v39_v36 = vpop.permute.xlu0 %38 }
  0x7e   :  { %vm55_vm3 = vcmp.eq.s32.totalorder %v1056_v40, %v33_v35  ;;  %vm57_vm9 = vcmp.eq.s32.totalorder %v1056_v40, %v39_v36 }
  0x81   :  { %v36_v38 = vpop.permute.xlu1 %35 }
  0x82   :  { %v85_v39 = vpop.permute.xlu0 %84  ;;  %vm56_vm1 = vcmp.eq.s32.totalorder %v1056_v40, %v36_v38 }
  0x83   :  { %vm107_vm0 = vcmp.eq.s32.totalorder %v1056_v40, %v85_v39  ;;  %vm743_vm5 = vmpackc.low %vm56_vm1, %vm55_vm3 }
  0x86   :  { %v88_v41 = vpop.permute.xlu0 %87  ;;  %v94_v42 = vpop.permute.xlu1 %93 }
  0x87   :  { %vm108_vm2 = vcmp.eq.s32.totalorder %v1056_v40, %v88_v41  ;;  %vm110_vm6 = vcmp.eq.s32.totalorder %v1056_v40, %v94_v42 }
  0x88   :  { %vm741_vm4 = vmpackc.low %vm108_vm2, %vm107_vm0 }
  0x89   :  { %742 = vmatprep.mubr.msk.bf16.mxu0 %vm741_vm4, %v903_v43 }
  0x8a   :  { %v91_v44 = vpop.permute.xlu0 %90  ;;  %744 = vmatmul.mubr.msk.bf16.vlgmr.msra.gmra.mxu0 %vm743_vm5, %v903_v43 }
  0x8b   :  { %vm109_vm7 = vcmp.eq.s32.totalorder %v1056_v40, %v91_v44  ;;  %v42_v45 = vpop.permute.xlu1 %41 }
  0x8c   :  { %vm745_vm8 = vmpackc.low %vm110_vm6, %vm109_vm7  ;;  %vm58_vm10 = vcmp.eq.s32.totalorder %v1056_v40, %v42_v45 }
  0x8d   :  { %746 = vmatprep.mubr.msk.bf16.mxu0 %vm745_vm8, %v903_v43  ;;  %vm747_vm12 = vmpackc.low %vm58_vm10, %vm57_vm9 }
  0x8e   :  { %v100_v46 = vpop.permute.xlu0 %99 }
  0x8f   :  { %vm112_vm11 = vcmp.eq.s32.totalorder %v1056_v40, %v100_v46 }
  0x90   :  { %v97_v47 = vpop.permute.xlu1 %96 }
  0x91   :  { %vm111_vm13 = vcmp.eq.s32.totalorder %v1056_v40, %v97_v47 }
  0x92   :  { %vm749_vm14 = vmpackc.low %vm112_vm11, %vm111_vm13  ;;  %748 = vmatmul.mubr.msk.bf16.gmra.mxu0 %vm747_vm12, %v903_v43  ;;  %v106_v48 = vpop.permute.xlu0 %105 }
  0x93   :  { %750 = vmatprep.mubr.msk.bf16.mxu0 %vm749_vm14, %v903_v43  ;;  %vm114_vm8 = vcmp.eq.s32.totalorder %v1056_v40, %v106_v48 }
  0x95   :  { %v45_v49 = vpop.permute.xlu1 %44 }
  0x96   :  { %vm59_vm15 = vcmp.eq.s32.totalorder %v1056_v40, %v45_v49 }
  0x97   :  { %v137_v50 = vpop.permute.xlu0 %136 }
  0x98   :  { %vm159_vm2 = vcmp.eq.s32.totalorder %v1056_v40, %v137_v50 }
  0x99   :  { %v48_v51 = vpop.permute.xlu1 %47 }
  0x9a   :  { %vm60_vm0 = vcmp.eq.s32.totalorder %v1056_v40, %v48_v51 }
  0x9b   :  { %vm751_vm1 = vmpackc.low %vm60_vm0, %vm59_vm15  ;;  %v146_v53 = vpop.permute.xlu0 %145 }
  0x9c   :  { %752 = vmatmul.mubr.msk.bf16.gmra.mxu0 %vm751_vm1, %v903_v43  ;;  %vm162_vm5 = vcmp.eq.s32.totalorder %v1056_v40, %v146_v53 }
  0x9e   :  { %v140_v52 = vpop.permute.xlu1 %139 }
  0x9f   :  { %vm160_vm3 = vcmp.eq.s32.totalorder %v1056_v40, %v140_v52  ;;  %v149_v58 = vpop.permute.xlu0 %148 }
  0xa0   :  { %vm757_vm4 = vmpackc.low %vm160_vm3, %vm159_vm2  ;;  %vm163_vm14 = vcmp.eq.s32.totalorder %v1056_v40, %v149_v58 }
  0xa1   :  { %840 = vmatprep.mubr.msk.bf16.mxu1 %vm757_vm4, %v903_v43  ;;  %vm905_vm4 = vmmov 0  }
  0xa2   :  { %v143_v54 = vpop.permute.xlu1 %142 }
  0xa3   :  { %vm161_vm6 = vcmp.eq.s32.totalorder %v1056_v40, %v143_v54  ;;  %v158_v60 = vpop.permute.xlu0 %157 }
  0xa4   :  { %vm759_vm7 = vmpackc.low %vm162_vm5, %vm161_vm6  ;;  %vm166_vm1 = vcmp.eq.s32.totalorder %v1056_v40, %v158_v60  ;;  %vm524_vm5 = vcmask 261120   ;;  %vm616_vm6 = vcmask 1041409  }
  0xa5   :  { %841 = vmatmul.mubr.msk.bf16.vlgmr.msra.gmra.mxu1 %vm759_vm7, %v903_v43  ;;  %vm618_vm7 = vcmask 1042434  }
  0xa6   :  { %849 = vmatpush3.bf16.msra.mxu1 %v898_v62 }
  0xa7   :  { %v103_v55 = vpop.permute.xlu1 %102  ;;  %850 = vmatprep.subr.bf16.mxu1 %v904_v63 }
  0xa8   :  { %vm113_vm9 = vcmp.eq.s32.totalorder %v1056_v40, %v103_v55 }
  0xa9   :  { %vm753_vm10 = vmpackc.low %vm114_vm8, %vm113_vm9  ;;  %vm620_vm8 = vcmask 1043459   ;;  %vm622_vm9 = vcmask 1044484  }
  0xaa   :  { %754 = vmatprep.mubr.msk.bf16.mxu0 %vm753_vm10, %v903_v43  ;;  %851 = vmatpush3.bf16.msra.mxu1 %v899_v0  ;;  %vm624_vm10 = vcmask 1045509  }
  0xac   :  { %v51_v56 = vpop.permute.xlu1 %50 }
  0xad   :  { %vm61_vm11 = vcmp.eq.s32.totalorder %v1056_v40, %v51_v56 }
  0xb0   :  { %v54_v57 = vpop.permute.xlu1 %53 }
  0xb1   :  { %vm62_vm12 = vcmp.eq.s32.totalorder %v1056_v40, %v54_v57 }
  0xb2   :  { %vm755_vm13 = vmpackc.low %vm62_vm12, %vm61_vm11  ;;  %vm626_vm11 = vcmask 1046534   ;;  %vm628_vm12 = vcmask 1047559  }
  0xb3   :  { %756 = vmatmul.mubr.msk.bf16.gmra.mxu0 %vm755_vm13, %v903_v43  ;;  %vm686_vm13 = vcmask 31744  }
  0xb5   :  { %v152_v59 = vpop.permute.xlu1 %151 }
  0xb6   :  { %vm164_vm15 = vcmp.eq.s32.totalorder %v1056_v40, %v152_v59 }
  0xb7   :  { %vm761_vm0 = vmpackc.low %vm164_vm15, %vm163_vm14 }
  0xb8   :  { %844 = vmatprep.mubr.msk.bf16.mxu1 %vm761_vm0, %v903_v43 }
  0xb9   :  { %v155_v61 = vpop.permute.xlu1 %154 }
  0xba   :  { %vm165_vm2 = vcmp.eq.s32.totalorder %v1056_v40, %v155_v61 }
  0xbb   :  { %vm763_vm3 = vmpackc.low %vm166_vm1, %vm165_vm2 }
  0xbc   :  { %845 = vmatmul.mubr.msk.bf16.gmra.mxu1 %vm763_vm3, %v903_v43 }
  0xbd   :  { %852 = vmatprep.mubr.msk.bf16.mxu1 %vm905_vm4, %v904_v63 }
 0x14a   :  { %v785_v1 = vpop.f32.mrf.mxu0 }
 0x14c   :  { %v786_v2 = vpop.f32.mrf.mxu0 }
 0x14d   :  { %v787_v8 = vadd.f32 %v786_v2, %v785_v1 }
 0x14e   :  { %v788_v3 = vpop.f32.mrf.mxu0 }
 0x14f   :  { %v421_v16 = vadd.f32 %v787_v8, %v716_v10 }
 0x150   :  { %v789_v4 = vpop.f32.mrf.mxu0 }
 0x151   :  { %v790_v15 = vadd.f32 %v789_v4, %v788_v3 }
 0x152   :  { %v791_v5 = vpop.f32.mrf.mxu0 }
 0x153   :  { %v424_v24 = vadd.f32 %v790_v15, %v716_v10 }
 0x154   :  { %v792_v6 = vpop.f32.mrf.mxu0 }
 0x155   :  { %v793_v11 = vadd.f32 %v792_v6, %v791_v5 }
 0x156   :  { %v794_v7 = vpop.f32.mrf.mxu0 }
 0x157   :  { %v429_v18 = vadd.f32 %v793_v11, %v716_v10 }
 0x158   :  { %v795_v9 = vpop.f32.mrf.mxu0 }
 0x159   :  { %v796_v12 = vadd.f32 %v795_v9, %v794_v7 }
 0x15b   :  { %v432_v21 = vadd.f32 %v796_v12, %v716_v10 }
 0x15c   :  { %v797_v13 = vpop.f32.mrf.mxu0 }
 0x15e   :  { %v798_v20 = vpop.f32.mrf.mxu0 }
 0x15f   :  { %v799_v49 = vadd.f32 %v798_v20, %v797_v13 }
 0x160   :  { %v800_v29 = vpop.f32.mrf.mxu0 }
 0x161   :  { %v437_v61 = vadd.f32 %v799_v49, %v716_v10 }
 0x162   :  { %v801_v35 = vpop.f32.mrf.mxu0 }
 0x163   :  { %v802_v57 = vadd.f32 %v801_v35, %v800_v29 }
 0x165   :  { %v842_v14 = vpop.f32.mrf.mxu1  ;;  %v440_v6 = vadd.f32 %v802_v57, %v716_v10 }
 0x166   :  { %v494_v23 = vadd.f32 %v842_v14, %v429_v18 }
 0x167   :  { %v485_v17 = vpop.f32.mrf.mxu1 }
 0x168   :  { %v486_v19 = vadd.f32 %v485_v17, %v421_v16  ;;  %v518_v30 = vmax.f32 %v494_v23, 0.0 }
 0x169   :  { %v843_v22 = vpop.f32.mrf.mxu1 }
 0x16a   :  { %v516_v25 = vmax.f32 %v486_v19, 0.0  ;;  %v497_v26 = vadd.f32 %v843_v22, %v432_v21  ;;  %v539_v37 = vsel %vm524_vm5, %v518_v30, -inf }
 0x16b   :  { %v488_v27 = vpop.f32.mrf.mxu1  ;;  %v540_v42 = vrot.slane %v539_v37, 4 }
 0x16c   :  { %v489_v28 = vadd.f32 %v488_v27, %v424_v24  ;;  %v525_v32 = vsel %vm524_vm5, %v516_v25, -inf  ;;  %v519_v33 = vmax.f32 %v497_v26, 0.0 }
 0x16d   :  { %v526_v38 = vrot.slane %v525_v32, 4  ;;  %v541_v50 = vmax.f32 %v539_v37, %v540_v42 }
 0x16e   :  { %v517_v31 = vmax.f32 %v489_v28, 0.0  ;;  %v546_v39 = vsel %vm524_vm5, %v519_v33, -inf }
 0x16f   :  { %v527_v44 = vmax.f32 %v525_v32, %v526_v38  ;;  %v547_v45 = vrot.slane %v546_v39, 4  ;;  %v542_v59 = vrot.slane %v541_v50, 2 }
 0x170   :  { %v532_v34 = vsel %vm524_vm5, %v517_v31, -inf }
 0x171   :  { %v533_v36 = vrot.slane %v532_v34, 4  ;;  %v528_v52 = vrot.slane %v527_v44, 2  ;;  %v548_v53 = vmax.f32 %v546_v39, %v547_v45  ;;  %v543_v7 = vmax.f32 %v541_v50, %v542_v59 }
 0x173   :  { %v534_v40 = vmax.f32 %v532_v34, %v533_v36  ;;  %v803_v41 = vpop.f32.mrf.mxu0  ;;  %v529_v62 = vmax.f32 %v527_v44, %v528_v52  ;;  %v549_v63 = vrot.slane %v548_v53, 2  ;;  %v544_v22 = vrot.slane %v543_v7, 1 }
 0x175   :  { %v804_v43 = vpop.f32.mrf.mxu0  ;;  %v535_v46 = vrot.slane %v534_v40, 2  ;;  %v530_v12 = vrot.slane %v529_v62, 1  ;;  %v550_v13 = vmax.f32 %v548_v53, %v549_v63  ;;  %v545_v35 = vmax.f32 %v543_v7, %v544_v22 }
 0x176   :  { %v805_v47 = vadd.f32 %v804_v43, %v803_v41 }
 0x177   :  { %v806_v48 = vpop.f32.mrf.mxu0  ;;  %v536_v54 = vmax.f32 %v534_v40, %v535_v46  ;;  %v531_v24 = vmax.f32 %v529_v62, %v530_v12  ;;  %v551_v28 = vrot.slane %v550_v13, 1  ;;  %v583_v46 = vpack.c.bf16 %v545_v35, %v545_v35 }
 0x178   :  { %v445_v56 = vadd.f32 %v805_v47, %v716_v10 }
 0x179   :  { %v807_v51 = vpop.f32.mrf.mxu0  ;;  %v537_v1 = vrot.slane %v536_v54, 1  ;;  %v581_v36 = vpack.c.bf16 %v531_v24, %v531_v24  ;;  %v552_v40 = vmax.f32 %v550_v13, %v551_v28  ;;  %v610_v57 = vunpack.c.l.b16 %v583_v46 }
 0x17a   :  { %v808_v55 = vadd.f32 %v807_v51, %v806_v48 }
 0x17b   :  { %v538_v16 = vmax.f32 %v536_v54, %v537_v1  ;;  %v608_v47 = vunpack.c.l.b16 %v581_v36  ;;  %v584_v51 = vpack.c.bf16 %v552_v40, %v552_v40 }
 0x17c   :  { %v846_v58 = vpop.f32.mrf.mxu1  ;;  %v448_v4 = vadd.f32 %v808_v55, %v716_v10 }
 0x17d   :  { %v510_v60 = vadd.f32 %v846_v58, %v445_v56  ;;  %v582_v29 = vpack.c.bf16 %v538_v16, %v538_v16  ;;  %v611_v62 = vunpack.c.l.b16 %v584_v51 }
 0x17e   :  { %v501_v0 = vpop.f32.mrf.mxu1 }
 0x17f   :  { %v522_v2 = vmax.f32 %v510_v60, 0.0  ;;  %v502_v3 = vadd.f32 %v501_v0, %v437_v61  ;;  %v609_v42 = vunpack.c.l.b16 %v582_v29 }
 0x180   :  { %v847_v5 = vpop.f32.mrf.mxu1 }
 0x181   :  { %v567_v8 = vsel %vm524_vm5, %v522_v2, -inf  ;;  %v520_v9 = vmax.f32 %v502_v3, 0.0  ;;  %v513_v11 = vadd.f32 %v847_v5, %v448_v4  ;;  %v617_v53 = vsel %vm616_vm6, %v609_v42, %v608_v47 }
 0x182   :  { %v568_v14 = vrot.slane %v567_v8, 4  ;;  %v504_v15 = vpop.f32.mrf.mxu1  ;;  %v619_v59 = vsel %vm618_vm7, %v610_v57, %v617_v53 }
 0x183   :  { %v553_v17 = vsel %vm524_vm5, %v520_v9, -inf  ;;  %v523_v18 = vmax.f32 %v513_v11, 0.0  ;;  %v505_v19 = vadd.f32 %v504_v15, %v440_v6  ;;  %v621_v1 = vsel %vm620_vm8, %v611_v62, %v619_v59  ;;  %v765_v11 = vld [vmem:[%s1110_s4] ss:$0 sm:$0xff] }
 0x184   :  { %v569_v20 = vmax.f32 %v567_v8, %v568_v14  ;;  %v554_v21 = vrot.slane %v553_v17, 4 }
 0x185   :  { %v574_v23 = vsel %vm524_vm5, %v523_v18, -inf  ;;  %v521_v10 = vmax.f32 %v505_v19, 0.0 }
 0x186   :  { %v570_v25 = vrot.slane %v569_v20, 2  ;;  %v555_v26 = vmax.f32 %v553_v17, %v554_v21  ;;  %v575_v27 = vrot.slane %v574_v23, 4 }
 0x187   :  { %v560_v30 = vsel %vm524_vm5, %v521_v10, -inf }
 0x188   :  { %v571_v31 = vmax.f32 %v569_v20, %v570_v25  ;;  %v556_v32 = vrot.slane %v555_v26, 2  ;;  %v576_v33 = vmax.f32 %v574_v23, %v575_v27  ;;  %v561_v34 = vrot.slane %v560_v30, 4 }
 0x18a   :  { %v557_v37 = vmax.f32 %v555_v26, %v556_v32  ;;  %v577_v38 = vrot.slane %v576_v33, 2  ;;  %v562_v39 = vmax.f32 %v560_v30, %v561_v34  ;;  %v572_v41 = vrot.slane %v571_v31, 1 }
 0x18c   :  { %v558_v43 = vrot.slane %v557_v37, 1  ;;  %v578_v44 = vmax.f32 %v576_v33, %v577_v38  ;;  %v563_v45 = vrot.slane %v562_v39, 2  ;;  %v573_v52 = vmax.f32 %v571_v31, %v572_v41 }
 0x18e   :  { %v559_v48 = vmax.f32 %v557_v37, %v558_v43  ;;  %v579_v49 = vrot.slane %v578_v44, 1  ;;  %v564_v50 = vmax.f32 %v562_v39, %v563_v45  ;;  %v587_v60 = vpack.c.bf16 %v573_v52, %v573_v52 }
 0x190   :  { %v585_v54 = vpack.c.bf16 %v559_v48, %v559_v48  ;;  %v580_v55 = vmax.f32 %v578_v44, %v579_v49  ;;  %v565_v56 = vrot.slane %v564_v50, 1  ;;  %v614_v3 = vunpack.c.l.b16 %v587_v60 }
 0x192   :  { %v566_v58 = vmax.f32 %v564_v50, %v565_v56  ;;  %v612_v61 = vunpack.c.l.b16 %v585_v54  ;;  %v588_v63 = vpack.c.bf16 %v580_v55, %v580_v55 }
 0x194   :  { %v586_v0 = vpack.c.bf16 %v566_v58, %v566_v58  ;;  %v623_v4 = vsel %vm622_vm9, %v612_v61, %v621_v1  ;;  %v615_v5 = vunpack.c.l.b16 %v588_v63 }
 0x196   :  { %v613_v2 = vunpack.c.l.b16 %v586_v0 }
 0x198   :  { %v625_v6 = vsel %vm624_vm10, %v613_v2, %v623_v4 }
 0x199   :  { %v627_v7 = vsel %vm626_vm11, %v614_v3, %v625_v6 }
 0x19a   :  { %v629_v8 = vsel %vm628_vm12, %v615_v5, %v627_v7 }
 0x19b   :  { %v630_v9 = vpack.c.b16 %v629_v8, %v629_v8 }
 0x19d   :  { %853 = vmatmul.mubr.msk.bf16.vlgmr.msra.gmra.mxu1 %vm524_vm5, %v630_v9 }
 0x25d   :  { %v680_v12 = vpop.f32.mrf.mxu1 }
 0x25e   :  { %v681_v13 = vadd.f32 %v765_v11, %v680_v12 }
 0x25f   :  { %v854_v14 = vpop.f32.mrf.mxu1 }
 0x260   :  { %687 = vst.msk [vmem:[%s1111_s5] sm:$0xff] %vm686_vm13, %v681_v13 }
 0x261   :  { %v683_v15 = vpop.f32.mrf.mxu1 }
 0x263   :  { %v855_v16 = vpop.f32.mrf.mxu1 }

</bundles_post_ra>
